<compile_context>
chip_gen: v7x
topology: tpu7x:2x2x1
jax: 0.10.0
libtpu: 0.0.40
codegen_flags: <defaults>
</compile_context>

<pallas_src>
import jax
import jax.numpy as jnp
from jax.experimental import pallas as pl
from jax.experimental.pallas import tpu as pltpu


def make_attention_kernel(batch_block, N, C, num_heads):
    head_dim = C // num_heads
    rows = batch_block * N  # rows of x handled by one grid step

    def kernel(x_ref, wqkv_ref, wproj_ref, bproj_ref, bias_ref, o_ref):
        # x_ref:     (rows, C)           activations for `batch_block` batch items
        # wqkv_ref:  (3, H, C, hd)       head-major QKV weights; scale folded into [0]
        # wproj_ref: (H, hd, C)          head-major output-projection weights
        # bproj_ref: (1, C)              output-projection bias
        # bias_ref:  (rows, rows)        0 within a batch item, -1e30 across items
        x = x_ref[...]                                        # (rows, C)
        # Hoisted once: broadcast x over heads so every matmul below is a plain
        # leading-batch 3-D contraction (no transposes / lane slices in-kernel).
        xh = jnp.broadcast_to(x, (num_heads, rows, C))        # (H, rows, C)

        q = jnp.einsum("hrc,hcd->hrd", xh, wqkv_ref[0],
                       preferred_element_type=jnp.float32)    # (H, rows, hd) pre-scaled
        k = jnp.einsum("hrc,hcd->hrd", xh, wqkv_ref[1],
                       preferred_element_type=jnp.float32)
        v = jnp.einsum("hrc,hcd->hrd", xh, wqkv_ref[2],
                       preferred_element_type=jnp.float32)

        # Scores: contract on the last dim of both operands (no explicit k.T).
        s = jnp.einsum("hrd,hsd->hrs", q, k,
                       preferred_element_type=jnp.float32)    # (H, rows, rows)
        s = s + bias_ref[...][None, :, :]                     # block-diag batch mask

        # Softmax (max-subtracted, f32); divide pushed onto the EUP.
        s = s - jnp.max(s, axis=-1, keepdims=True)
        p = jnp.exp(s)
        l = jnp.sum(p, axis=-1, keepdims=True)
        p = p * pl.reciprocal(l, approx=True)

        o = jnp.einsum("hrs,hsd->hrd", p, v,
                       preferred_element_type=jnp.float32)    # (H, rows, hd)

        # Per-head output projection summed over heads == concat(heads) @ Wproj.
        y = jnp.einsum("hrd,hdc->hrc", o, wproj_ref[...],
                       preferred_element_type=jnp.float32)    # (H, rows, C)
        out = jnp.sum(y, axis=0) + bproj_ref[...]             # (rows, C)

        # Note: C=32 (<128 lanes) -> masked stores; unavoidable at this model dim.
        o_ref[...] = out.astype(o_ref.dtype)

    return kernel


def attention_pallas(x, wqkv, wproj, bproj, num_heads, qk_scale=None,
                     batch_block=None):
    """x: (B, N, C) f32; wqkv: (C, 3C) (in,out); wproj: (C, C); bproj: (C,)."""
    B, N, C = x.shape
    head_dim = C // num_heads
    scale = qk_scale if qk_scale is not None else head_dim ** (-0.5)

    if batch_block is None:
        # v5e/v6e (1 TensorCore): one grid step.  On v7x pass batch_block=B//2
        # so both TensorCores get a 'parallel' grid step.
        batch_block = B
    assert B % batch_block == 0, "batch_block must divide B"
    G = B // batch_block
    rows = batch_block * N

    # ---- weight prep (pure JAX, outside the kernel, one-time) ----
    # wqkv columns are ordered [q|k|v] x head x head_dim, matching
    # reshape(B, N, 3, H, hd) in the PyTorch forward.
    w3 = jnp.transpose(wqkv.reshape(C, 3, num_heads, head_dim), (1, 2, 0, 3))
    w3 = w3.at[0].multiply(jnp.asarray(scale, w3.dtype))       # fold scale into Q
    wproj_r = wproj.reshape(num_heads, head_dim, C)            # (H, hd, C)
    bproj2d = bproj.reshape(1, C)

    # Block-diagonal additive mask keeping batch items independent inside a block.
    bidx = jnp.arange(rows) // N
    bias = jnp.where(bidx[:, None] == bidx[None, :], 0.0, -1e30).astype(jnp.float32)

    x2d = x.reshape(B * N, C)

    kernel = make_attention_kernel(batch_block, N, C, num_heads)

    # Advisory cost hint for XLA scheduling around this custom call.
    flops = (2 * B * N * C * 3 * C                       # qkv projection
             + 2 * 2 * num_heads * G * rows * rows * head_dim   # scores + pv
             + 2 * B * N * C * C)                        # output projection
    transcendentals = num_heads * G * rows * rows        # exp
    bytes_accessed = 4 * (x2d.size + w3.size + wproj_r.size + bproj2d.size
                          + bias.size + B * N * C)

    out2d = pl.pallas_call(
        kernel,
        out_shape=jax.ShapeDtypeStruct((B * N, C), x.dtype),
        grid_spec=pltpu.PrefetchScalarGridSpec(
            num_scalar_prefetch=0,
            grid=(G,),
            in_specs=[
                pl.BlockSpec((rows, C), lambda g: (g, 0)),
                pl.BlockSpec((3, num_heads, C, head_dim), lambda g: (0, 0, 0, 0)),
                pl.BlockSpec((num_heads, head_dim, C), lambda g: (0, 0, 0)),
                pl.BlockSpec((1, C), lambda g: (0, 0)),
                pl.BlockSpec((rows, rows), lambda g: (0, 0)),
            ],
            out_specs=pl.BlockSpec((rows, C), lambda g: (g, 0)),
        ),
        compiler_params=pltpu.CompilerParams(
            dimension_semantics=("parallel",)),
        cost_estimate=pl.CostEstimate(
            flops=flops,
            transcendentals=transcendentals,
            bytes_accessed=bytes_accessed),
    )(x2d, w3, wproj_r, bproj2d, bias)

    return out2d.reshape(B, N, C)


def attention_ref(x, wqkv, wproj, bproj, num_heads):
    """Pure-JAX reference mirroring the PyTorch forward."""
    B, N, C = x.shape
    head_dim = C // num_heads
    scale = head_dim ** (-0.5)
    qkv = x @ wqkv                                      # (B, N, 3C)
    qkv = qkv.reshape(B, N, 3, num_heads, head_dim)
    qkv = jnp.transpose(qkv, (2, 0, 3, 1, 4))           # (3, B, H, N, hd)
    q, k, v = qkv[0], qkv[1], qkv[2]
    attn = jnp.einsum("bhnd,bhmd->bhnm", q, k) * scale
    attn = jax.nn.softmax(attn, axis=-1)
    y = jnp.einsum("bhnm,bhmd->bhnd", attn, v)
    y = jnp.transpose(y, (0, 2, 1, 3)).reshape(B, N, C)
    return y @ wproj + bproj


if __name__ == "__main__":
    # Small shapes consistent with the module: dim=32, num_heads=8 (head_dim=4)
    B, N, C = 2, 8, 32
    num_heads = 8

    key = jax.random.PRNGKey(0)
    kx, kq, kp, kb = jax.random.split(key, 4)

    x = jax.random.normal(kx, (B, N, C), dtype=jnp.float32)
    # PyTorch Linear weight is (out, in); we store the transposed (in, out)
    # layout so the kernel does x @ W.  qkv_bias=False (module default).
    wqkv = jax.random.normal(kq, (C, 3 * C), dtype=jnp.float32) * 0.05
    wproj = jax.random.normal(kp, (C, C), dtype=jnp.float32) * 0.05
    bproj = jax.random.normal(kb, (C,), dtype=jnp.float32) * 0.05

    out = attention_pallas(x, wqkv, wproj, bproj, num_heads)
    out = jax.block_until_ready(out)

    ref = attention_ref(x, wqkv, wproj, bproj, num_heads)
    assert out.shape == (B, N, C)
    # Tolerance slightly loosened because the softmax denominator uses the
    # EUP approximate reciprocal (pl.reciprocal(approx=True)).
    assert jnp.allclose(out, ref, atol=5e-3, rtol=5e-3), \
        float(jnp.max(jnp.abs(out - ref)))

    print("KERNEL_OK")
</pallas_src>

<mosaic_0001>
module attributes {stable_mosaic.version = 11 : i64} {
  func.func @kernel(%arg0: i32, %arg1: memref<16x32xf32, #tpu.memory_space<vmem>>, %arg2: memref<3x8x32x4xf32, #tpu.memory_space<vmem>>, %arg3: memref<8x4x32xf32, #tpu.memory_space<vmem>>, %arg4: memref<1x32xf32, #tpu.memory_space<vmem>>, %arg5: memref<16x16xf32, #tpu.memory_space<vmem>>, %arg6: memref<16x32xf32, #tpu.memory_space<vmem>>) attributes {dimension_semantics = [#tpu.dimension_semantics<parallel>], iteration_bounds = array<i64: 1>, scalar_prefetch = 0 : i64, scratch_operands = 0 : i64, tpu.core_type = #tpu.core_type<tc>, window_params = [{transform_indices = @transform_0, window_bounds = array<i64: 16, 32>}, {pipeline_mode = #tpu.pipeline_mode<synchronous>, transform_indices = @transform_1, window_bounds = array<i64: 3, 8, 32, 4>}, {pipeline_mode = #tpu.pipeline_mode<synchronous>, transform_indices = @transform_2, window_bounds = array<i64: 8, 4, 32>}, {pipeline_mode = #tpu.pipeline_mode<synchronous>, transform_indices = @transform_3, window_bounds = array<i64: 1, 32>}, {pipeline_mode = #tpu.pipeline_mode<synchronous>, transform_indices = @transform_4, window_bounds = array<i64: 16, 16>}, {transform_indices = @transform_5, window_bounds = array<i64: 16, 32>}]} {
    %c0 = arith.constant 0 : index
    %c0_0 = arith.constant 0 : index
    %0 = vector.load %arg1[%c0, %c0_0] : memref<16x32xf32, #tpu.memory_space<vmem>>, vector<16x32xf32>
    %1 = vector.shape_cast %0 : vector<16x32xf32> to vector<1x16x32xf32>
    %2 = vector.broadcast %1 : vector<1x16x32xf32> to vector<8x16x32xf32>
    %c0_1 = arith.constant 0 : index
    %c0_2 = arith.constant 0 : index
    %c0_3 = arith.constant 0 : index
    %c0_4 = arith.constant 0 : index
    %3 = vector.load %arg2[%c0_1, %c0_2, %c0_3, %c0_4] : memref<3x8x32x4xf32, #tpu.memory_space<vmem>>, vector<1x8x32x4xf32>
    %4 = vector.shape_cast %3 : vector<1x8x32x4xf32> to vector<8x32x4xf32>
    "tpu.trace_start"() <{level = 10 : i32, message = "hrc,hcd->hrd"}> : () -> ()
    %cst = arith.constant dense<0.000000e+00> : vector<8x16x4xf32>
    %5 = tpu.matmul %2, %4, %cst {dimension_numbers = #tpu.dot_dimension_numbers<[2], [1], [1], [2], [0, 0, 0, 1, 1, 2], [0], [0]>} : vector<8x16x32xf32>, vector<8x32x4xf32>, vector<8x16x4xf32> -> vector<8x16x4xf32>
    "tpu.trace_stop"() : () -> ()
    %c1 = arith.constant 1 : index
    %c0_5 = arith.constant 0 : index
    %c0_6 = arith.constant 0 : index
    %c0_7 = arith.constant 0 : index
    %6 = vector.load %arg2[%c1, %c0_5, %c0_6, %c0_7] : memref<3x8x32x4xf32, #tpu.memory_space<vmem>>, vector<1x8x32x4xf32>
    %7 = vector.shape_cast %6 : vector<1x8x32x4xf32> to vector<8x32x4xf32>
    "tpu.trace_start"() <{level = 10 : i32, message = "hrc,hcd->hrd"}> : () -> ()
    %cst_8 = arith.constant dense<0.000000e+00> : vector<8x16x4xf32>
    %8 = tpu.matmul %2, %7, %cst_8 {dimension_numbers = #tpu.dot_dimension_numbers<[2], [1], [1], [2], [0, 0, 0, 1, 1, 2], [0], [0]>} : vector<8x16x32xf32>, vector<8x32x4xf32>, vector<8x16x4xf32> -> vector<8x16x4xf32>
    "tpu.trace_stop"() : () -> ()
    %c2 = arith.constant 2 : index
    %c0_9 = arith.constant 0 : index
    %c0_10 = arith.constant 0 : index
    %c0_11 = arith.constant 0 : index
    %9 = vector.load %arg2[%c2, %c0_9, %c0_10, %c0_11] : memref<3x8x32x4xf32, #tpu.memory_space<vmem>>, vector<1x8x32x4xf32>
    %10 = vector.shape_cast %9 : vector<1x8x32x4xf32> to vector<8x32x4xf32>
    "tpu.trace_start"() <{level = 10 : i32, message = "hrc,hcd->hrd"}> : () -> ()
    %cst_12 = arith.constant dense<0.000000e+00> : vector<8x16x4xf32>
    %11 = tpu.matmul %2, %10, %cst_12 {dimension_numbers = #tpu.dot_dimension_numbers<[2], [1], [1], [2], [0, 0, 0, 1, 1, 2], [0], [0]>} : vector<8x16x32xf32>, vector<8x32x4xf32>, vector<8x16x4xf32> -> vector<8x16x4xf32>
    "tpu.trace_stop"() : () -> ()
    "tpu.trace_start"() <{level = 10 : i32, message = "hrd,hsd->hrs"}> : () -> ()
    %cst_13 = arith.constant dense<0.000000e+00> : vector<8x16x16xf32>
    %12 = tpu.matmul %5, %8, %cst_13 {dimension_numbers = #tpu.dot_dimension_numbers<[2], [2], [1], [1], [0, 0, 0, 1, 1, 1], [0], [0]>} : vector<8x16x4xf32>, vector<8x16x4xf32>, vector<8x16x16xf32> -> vector<8x16x16xf32>
    "tpu.trace_stop"() : () -> ()
    %c0_14 = arith.constant 0 : index
    %c0_15 = arith.constant 0 : index
    %13 = vector.load %arg5[%c0_14, %c0_15] : memref<16x16xf32, #tpu.memory_space<vmem>>, vector<16x16xf32>
    %14 = vector.shape_cast %13 : vector<16x16xf32> to vector<1x16x16xf32>
    %15 = vector.broadcast %14 : vector<1x16x16xf32> to vector<8x16x16xf32>
    %16 = arith.addf %12, %15 : vector<8x16x16xf32>
    %cst_16 = arith.constant dense<0xFF800000> : vector<8x16xf32>
    %17 = vector.multi_reduction <maximumf>, %16, %cst_16 [2] : vector<8x16x16xf32> to vector<8x16xf32>
    %18 = vector.shape_cast %17 : vector<8x16xf32> to vector<8x16x1xf32>
    %19 = vector.broadcast %18 : vector<8x16x1xf32> to vector<8x16x16xf32>
    %20 = arith.subf %16, %19 : vector<8x16x16xf32>
    %21 = math.exp %20 : vector<8x16x16xf32>
    %cst_17 = arith.constant dense<0.000000e+00> : vector<8x16xf32>
    %22 = vector.multi_reduction <add>, %21, %cst_17 [2] : vector<8x16x16xf32> to vector<8x16xf32>
    %23 = vector.shape_cast %22 : vector<8x16xf32> to vector<8x16x1xf32>
    %24 = tpu.reciprocal %23 {approx = true} : vector<8x16x1xf32> -> vector<8x16x1xf32>
    %25 = vector.broadcast %24 : vector<8x16x1xf32> to vector<8x16x16xf32>
    %26 = arith.mulf %21, %25 : vector<8x16x16xf32>
    "tpu.trace_start"() <{level = 10 : i32, message = "hrs,hsd->hrd"}> : () -> ()
    %cst_18 = arith.constant dense<0.000000e+00> : vector<8x16x4xf32>
    %27 = tpu.matmul %26, %11, %cst_18 {dimension_numbers = #tpu.dot_dimension_numbers<[2], [1], [1], [2], [0, 0, 0, 1, 1, 2], [0], [0]>} : vector<8x16x16xf32>, vector<8x16x4xf32>, vector<8x16x4xf32> -> vector<8x16x4xf32>
    "tpu.trace_stop"() : () -> ()
    %c0_19 = arith.constant 0 : index
    %c0_20 = arith.constant 0 : index
    %c0_21 = arith.constant 0 : index
    %28 = vector.load %arg3[%c0_19, %c0_20, %c0_21] : memref<8x4x32xf32, #tpu.memory_space<vmem>>, vector<8x4x32xf32>
    "tpu.trace_start"() <{level = 10 : i32, message = "hrd,hdc->hrc"}> : () -> ()
    %cst_22 = arith.constant dense<0.000000e+00> : vector<8x16x32xf32>
    %29 = tpu.matmul %27, %28, %cst_22 {dimension_numbers = #tpu.dot_dimension_numbers<[2], [1], [1], [2], [0, 0, 0, 1, 1, 2], [0], [0]>} : vector<8x16x4xf32>, vector<8x4x32xf32>, vector<8x16x32xf32> -> vector<8x16x32xf32>
    "tpu.trace_stop"() : () -> ()
    %cst_23 = arith.constant dense<0.000000e+00> : vector<16x32xf32>
    %30 = vector.multi_reduction <add>, %29, %cst_23 [0] : vector<8x16x32xf32> to vector<16x32xf32>
    %c0_24 = arith.constant 0 : index
    %c0_25 = arith.constant 0 : index
    %31 = vector.load %arg4[%c0_24, %c0_25] : memref<1x32xf32, #tpu.memory_space<vmem>>, vector<1x32xf32>
    %32 = vector.broadcast %31 : vector<1x32xf32> to vector<16x32xf32>
    %33 = arith.addf %30, %32 : vector<16x32xf32>
    %c0_26 = arith.constant 0 : index
    %c0_27 = arith.constant 0 : index
    %34 = vector.load %arg6[%c0_26, %c0_27] : memref<16x32xf32, #tpu.memory_space<vmem>>, vector<16x32xf32>
    tpu.vector_store %arg6[%c0_26, %c0_27], %33 {strides = array<i32>} : memref<16x32xf32, #tpu.memory_space<vmem>>, vector<16x32xf32>,
    return
  }
  func.func @transform_0(%arg0: i32) -> (i32, i32) {
    %c0_i32 = arith.constant 0 : i32
    %c0_i32_0 = arith.constant 0 : i32
    return %arg0, %c0_i32 : i32, i32
  }
  func.func @transform_1(%arg0: i32) -> (i32, i32, i32, i32) {
    %c0_i32 = arith.constant 0 : i32
    %c0_i32_0 = arith.constant 0 : i32
    %c0_i32_1 = arith.constant 0 : i32
    %c0_i32_2 = arith.constant 0 : i32
    %c0_i32_3 = arith.constant 0 : i32
    return %c0_i32, %c0_i32_0, %c0_i32_1, %c0_i32_2 : i32, i32, i32, i32
  }
  func.func @transform_2(%arg0: i32) -> (i32, i32, i32) {
    %c0_i32 = arith.constant 0 : i32
    %c0_i32_0 = arith.constant 0 : i32
    %c0_i32_1 = arith.constant 0 : i32
    %c0_i32_2 = arith.constant 0 : i32
    return %c0_i32, %c0_i32_0, %c0_i32_1 : i32, i32, i32
  }
  func.func @transform_3(%arg0: i32) -> (i32, i32) {
    %c0_i32 = arith.constant 0 : i32
    %c0_i32_0 = arith.constant 0 : i32
    %c0_i32_1 = arith.constant 0 : i32
    return %c0_i32, %c0_i32_0 : i32, i32
  }
  func.func @transform_4(%arg0: i32) -> (i32, i32) {
    %c0_i32 = arith.constant 0 : i32
    %c0_i32_0 = arith.constant 0 : i32
    %c0_i32_1 = arith.constant 0 : i32
    return %c0_i32, %c0_i32_0 : i32, i32
  }
  func.func @transform_5(%arg0: i32) -> (i32, i32) {
    %c0_i32 = arith.constant 0 : i32
    %c0_i32_0 = arith.constant 0 : i32
    return %arg0, %c0_i32 : i32, i32
  }
}

</mosaic_0001>

<bundles_post_ra>
// kernel: tpu_custom_call.1
= control target key start
LH: loop header
LB: loop body
LE: loop exit
PB: predicated region body
PF: predicated region fallthrough
CT: control target
= control target key end

     0   :  { %vm55_vm0 = vcmask 261120   ;;  %s6168_s0 = inlined_call_operand.vmem [shape: f32[16,32], index: 0, kind: input, shape index: {}]   ;;  %s6169_s1 = inlined_call_operand.vmem [shape: f32[3,8,32,4], index: 1, kind: input, shape index: {}]   ;;  %s6170_s2 = inlined_call_operand.vmem [shape: f32[8,4,32], index: 2, kind: input, shape index: {}]   ;;  %s6171_s3 = inlined_call_operand.vmem [shape: f32[1,32], index: 3, kind: input, shape index: {}]   ;;  %s6172_s4 = inlined_call_operand.vmem [shape: f32[16,16], index: 4, kind: input, shape index: {}]   ;;  %s6173_s5 = inlined_call_operand.hbm [shape: f32[16,32], index: 5, kind: output, shape index: {}]  }
   0x1   :  { %v23_v0 = vld [vmem:[%s6169_s1] sm:$0xff]  ;;  %v24_v1 = vld [vmem:[%s6169_s1 + $0x8] sm:$0xff]  ;;  %v25_v5 = vld [vmem:[%s6169_s1 + $0x10] sm:$0xff] }
   0x2   :  { %v27_v2 = vld [vmem:[%s6169_s1 + $0x20] sm:$0xff]  ;;  %v5023_v3 = vpack.c.bf16 %v24_v1, %v23_v0  ;;  %v28_v4 = vld [vmem:[%s6169_s1 + $0x28] sm:$0xff]  ;;  %v26_v6 = vld [vmem:[%s6169_s1 + $0x18] sm:$0xff] }
   0x3   :  { %v5031_v7 = vpack.c.bf16 %v28_v4, %v27_v2  ;;  %v5027_v8 = vpack.c.bf16 %v26_v6, %v25_v5  ;;  %v29_v9 = vld [vmem:[%s6169_s1 + $0x30] sm:$0xff]  ;;  %v30_v10 = vld [vmem:[%s6169_s1 + $0x38] sm:$0xff]  ;;  %v5446_v11 = vld [vmem:[%s6168_s0] sm:$0xff] }
   0x4   :  { %5024 = vmatprep.subr.bf16.mxu0 %v5023_v3  ;;  %v5035_v12 = vpack.c.bf16 %v30_v10, %v29_v9  ;;  %4615 = vmatprep.mubr.msk.f32.mxu0 %vm55_vm0, %v5446_v11  ;;  %v31_v13 = vld [vmem:[%s6169_s1 + $0x40] sm:$0xff]  ;;  %v32_v14 = vld [vmem:[%s6169_s1 + $0x48] sm:$0xff]  ;;  %v33_v19 = vld [vmem:[%s6169_s1 + $0x50] sm:$0xff] }
   0x5   :  { %5032 = vmatprep.subr.bf16.mxu1 %v5031_v7  ;;  %5026 = vmatpush3.bf16.msra.mxu0 %v5023_v3  ;;  %v35_v15 = vld [vmem:[%s6169_s1 + $0x60] sm:$0xff]  ;;  %v36_v16 = vld [vmem:[%s6169_s1 + $0x68] sm:$0xff]  ;;  %v5039_v17 = vpack.c.bf16 %v32_v14, %v31_v13  ;;  %v34_v20 = vld [vmem:[%s6169_s1 + $0x58] sm:$0xff] }
   0x6   :  { %5034 = vmatpush3.bf16.msra.mxu1 %v5031_v7  ;;  %5028 = vmatprep.subr.bf16.mxu0 %v5027_v8  ;;  %v5047_v18 = vpack.c.bf16 %v36_v16, %v35_v15  ;;  %v37_v21 = vld [vmem:[%s6169_s1 + $0x70] sm:$0xff]  ;;  %v38_v22 = vld [vmem:[%s6169_s1 + $0x78] sm:$0xff]  ;;  %v5479_v23 = vld [vmem:[%s6168_s0 + $0x8] sm:$0xff]  ;;  %v5043_v24 = vpack.c.bf16 %v34_v20, %v33_v19 }
   0x7   :  { %5036 = vmatprep.subr.bf16.mxu1 %v5035_v12  ;;  %4626 = vmatprep.mubr.msk.f32.mxu1 %vm55_vm0, %v5446_v11  ;;  %v5051_v25 = vpack.c.bf16 %v38_v22, %v37_v21  ;;  %v39_v26 = vld [vmem:[%s6169_s1 + $0x80] sm:$0xff]  ;;  %v40_v27 = vld [vmem:[%s6169_s1 + $0x88] sm:$0xff]  ;;  %v41_v32 = vld [vmem:[%s6169_s1 + $0x90] sm:$0xff] }
   0x8   :  { %v43_v28 = vld [vmem:[%s6169_s1 + $0xa0] sm:$0xff]  ;;  %v44_v29 = vld [vmem:[%s6169_s1 + $0xa8] sm:$0xff]  ;;  %v5055_v30 = vpack.c.bf16 %v40_v27, %v39_v26  ;;  %v42_v33 = vld [vmem:[%s6169_s1 + $0x98] sm:$0xff] }
   0x9   :  { %5030 = vmatpush3.bf16.msra.mxu0 %v5027_v8  ;;  %v5063_v31 = vpack.c.bf16 %v44_v29, %v43_v28  ;;  %v45_v34 = vld [vmem:[%s6169_s1 + $0xb0] sm:$0xff]  ;;  %v46_v35 = vld [vmem:[%s6169_s1 + $0xb8] sm:$0xff]  ;;  %v5059_v36 = vpack.c.bf16 %v42_v33, %v41_v32  ;;  %v47_v38 = vld [vmem:[%s6169_s1 + $0xc0] sm:$0xff] }
   0xa   :  { %5038 = vmatpush3.bf16.msra.mxu1 %v5035_v12  ;;  %5040 = vmatprep.subr.bf16.mxu0 %v5039_v17  ;;  %v5067_v37 = vpack.c.bf16 %v46_v35, %v45_v34  ;;  %v48_v39 = vld [vmem:[%s6169_s1 + $0xc8] sm:$0xff]  ;;  %v51_v40 = vld [vmem:[%s6169_s1 + $0xe0] sm:$0xff]  ;;  %v49_v44 = vld [vmem:[%s6169_s1 + $0xd0] sm:$0xff] }
   0xb   :  { %5048 = vmatprep.subr.bf16.mxu1 %v5047_v18  ;;  %v52_v41 = vld [vmem:[%s6169_s1 + $0xe8] sm:$0xff]  ;;  %v5071_v42 = vpack.c.bf16 %v48_v39, %v47_v38  ;;  %v50_v45 = vld [vmem:[%s6169_s1 + $0xd8] sm:$0xff]  ;;  %v53_v46 = vld [vmem:[%s6169_s1 + $0xf0] sm:$0xff] }
   0xc   :  { %4616 = vmatmul.mubr.msk.f32.vlgmr.msra.gmra.mrb[0].mxu0 %vm55_vm0, %v5479_v23  ;;  %v5079_v43 = vpack.c.bf16 %v52_v41, %v51_v40  ;;  %v54_v47 = vld [vmem:[%s6169_s1 + $0xf8] sm:$0xff]  ;;  %v5075_v48 = vpack.c.bf16 %v50_v45, %v49_v44  ;;  %v4206_v50 = vld [vmem:[%s6169_s1 + $0x100] sm:$0xff]  ;;  %v4207_v51 = vld [vmem:[%s6169_s1 + $0x108] sm:$0xff] }
   0xd   :  { %4627 = vmatmul.mubr.msk.f32.vlgmr.msra.gmra.mrb[0].mxu1 %vm55_vm0, %v5479_v23  ;;  %5042 = vmatpush3.bf16.msra.mxu0 %v5039_v17  ;;  %v5083_v49 = vpack.c.bf16 %v54_v47, %v53_v46  ;;  %v4210_v52 = vld [vmem:[%s6169_s1 + $0x120] sm:$0xff]  ;;  %v4211_v53 = vld [vmem:[%s6169_s1 + $0x128] sm:$0xff]  ;;  %v5087_v54 = vpack.c.bf16 %v4207_v51, %v4206_v50  ;;  %v4208_v56 = vld [vmem:[%s6169_s1 + $0x110] sm:$0xff] }
   0xe   :  { %5050 = vmatpush3.bf16.msra.mxu1 %v5047_v18  ;;  %5044 = vmatprep.subr.bf16.mxu0 %v5043_v24  ;;  %v5095_v55 = vpack.c.bf16 %v4211_v53, %v4210_v52  ;;  %v4209_v57 = vld [vmem:[%s6169_s1 + $0x118] sm:$0xff]  ;;  %v4212_v58 = vld [vmem:[%s6169_s1 + $0x130] sm:$0xff] }
   0xf   :  { %5052 = vmatprep.subr.bf16.mxu1 %v5051_v25  ;;  %4637 = vmatprep.mubr.msk.f32.mxu0 %vm55_vm0, %v5446_v11  ;;  %v4213_v59 = vld [vmem:[%s6169_s1 + $0x138] sm:$0xff] }
  0x10   :  { %4648 = vmatprep.mubr.msk.f32.mxu1 %vm55_vm0, %v5446_v11 }
  0x11   :  { %5046 = vmatpush3.bf16.msra.mxu0 %v5043_v24 }
  0x12   :  { %5054 = vmatpush3.bf16.msra.mxu1 %v5051_v25  ;;  %5056 = vmatprep.subr.bf16.mxu0 %v5055_v30 }
  0x13   :  { %5064 = vmatprep.subr.bf16.mxu1 %v5063_v31 }
  0x14   :  { %4638 = vmatmul.mubr.msk.f32.vlgmr.msra.gmra.mrb[2].mxu0 %vm55_vm0, %v5479_v23 }
  0x15   :  { %4649 = vmatmul.mubr.msk.f32.vlgmr.msra.gmra.mrb[2].mxu1 %vm55_vm0, %v5479_v23  ;;  %5058 = vmatpush3.bf16.msra.mxu0 %v5055_v30 }
  0x16   :  { %5066 = vmatpush3.bf16.msra.mxu1 %v5063_v31  ;;  %5060 = vmatprep.subr.bf16.mxu0 %v5059_v36 }
  0x17   :  { %5068 = vmatprep.subr.bf16.mxu1 %v5067_v37  ;;  %4659 = vmatprep.mubr.msk.f32.mxu0 %vm55_vm0, %v5446_v11 }
  0x18   :  { %4670 = vmatprep.mubr.msk.f32.mxu1 %vm55_vm0, %v5446_v11 }
  0x19   :  { %5062 = vmatpush3.bf16.msra.mxu0 %v5059_v36 }
  0x1a   :  { %5070 = vmatpush3.bf16.msra.mxu1 %v5067_v37  ;;  %5072 = vmatprep.subr.bf16.mxu0 %v5071_v42 }
  0x1b   :  { %5080 = vmatprep.subr.bf16.mxu1 %v5079_v43 }
  0x1c   :  { %4660 = vmatmul.mubr.msk.f32.vlgmr.msra.gmra.mrb[4].mxu0 %vm55_vm0, %v5479_v23 }
  0x1d   :  { %4671 = vmatmul.mubr.msk.f32.vlgmr.msra.gmra.mrb[4].mxu1 %vm55_vm0, %v5479_v23  ;;  %5074 = vmatpush3.bf16.msra.mxu0 %v5071_v42 }
  0x1e   :  { %5082 = vmatpush3.bf16.msra.mxu1 %v5079_v43  ;;  %5076 = vmatprep.subr.bf16.mxu0 %v5075_v48 }
  0x1f   :  { %5084 = vmatprep.subr.bf16.mxu1 %v5083_v49  ;;  %4681 = vmatprep.mubr.msk.f32.mxu0 %vm55_vm0, %v5446_v11 }
  0x20   :  { %4692 = vmatprep.mubr.msk.f32.mxu1 %vm55_vm0, %v5446_v11 }
  0x21   :  { %5078 = vmatpush3.bf16.msra.mxu0 %v5075_v48 }
  0x22   :  { %10 = vsyncpa [#allocation3], 0  ;;  %5086 = vmatpush3.bf16.msra.mxu1 %v5083_v49  ;;  %5088 = vmatprep.subr.bf16.mxu0 %v5087_v54  ;;  %v5091_v60 = vpack.c.bf16 %v4209_v57, %v4208_v56  ;;  %v5099_v61 = vpack.c.bf16 %v4213_v59, %v4212_v58  ;;  %v4214_v62 = vld [vmem:[%s6169_s1 + $0x140] sm:$0xff]  ;;  %v4215_v63 = vld [vmem:[%s6169_s1 + $0x148] sm:$0xff]  ;;  %vm1930_vm1 = vcmask 31744   ;;  %vm2627_vm3 = vcmask 130048  }
  0x23   :  { %5096 = vmatprep.subr.bf16.mxu1 %v5095_v55  ;;  %v4218_v0 = vld [vmem:[%s6169_s1 + $0x160] sm:$0xff]  ;;  %v4219_v1 = vld [vmem:[%s6169_s1 + $0x168] sm:$0xff]  ;;  %v5103_v2 = vpack.c.bf16 %v4215_v63, %v4214_v62  ;;  %v4216_v4 = vld [vmem:[%s6169_s1 + $0x150] sm:$0xff]  ;;  %vm3466_vm4 = vcmask 1043456   ;;  %s5386_s26 = smov [#allocation2]  }
  0x24   :  { %4682 = vmatmul.mubr.msk.f32.vlgmr.msra.gmra.mrb[6].mxu0 %vm55_vm0, %v5479_v23  ;;  %v5111_v3 = vpack.c.bf16 %v4219_v1, %v4218_v0  ;;  %v4217_v5 = vld [vmem:[%s6169_s1 + $0x158] sm:$0xff]  ;;  %v4220_v6 = vld [vmem:[%s6169_s1 + $0x170] sm:$0xff]  ;;  %v4222_v10 = vld [vmem:[%s6169_s1 + $0x180] sm:$0xff]  ;;  %s4179_s27 = sshll.u32 %s5386_s26, 4  ;;  %s4180_s27 = int_to_ptr.vmem [resolvable:$true] %s4179_s27 }
  0x25   :  { %4693 = vmatmul.mubr.msk.f32.vlgmr.msra.gmra.mrb[6].mxu1 %vm55_vm0, %v5479_v23  ;;  %5090 = vmatpush3.bf16.msra.mxu0 %v5087_v54  ;;  %v4221_v7 = vld [vmem:[%s6169_s1 + $0x178] sm:$0xff]  ;;  %v5107_v8 = vpack.c.bf16 %v4217_v5, %v4216_v4  ;;  %v4223_v12 = vld [vmem:[%s6169_s1 + $0x188] sm:$0xff]  ;;  %v4226_v13 = vld [vmem:[%s6169_s1 + $0x1a0] sm:$0xff]  ;;  %s5362_s28 = scalar_lea.vmem %s4180_s27, 256  ;;  %p5367_p1 = scmp.lt.s32.totalorder %s4180_s27, %s4180_s27 }
  0x26   :  { %5098 = vmatpush3.bf16.msra.mxu1 %v5095_v55  ;;  %5092 = vmatprep.subr.bf16.mxu0 %v5091_v60  ;;  %v5115_v9 = vpack.c.bf16 %v4221_v7, %v4220_v6  ;;  %v4227_v14 = vld [vmem:[%s6169_s1 + $0x1a8] sm:$0xff]  ;;  %v5119_v15 = vpack.c.bf16 %v4223_v12, %v4222_v10  ;;  %v4224_v17 = vld [vmem:[%s6169_s1 + $0x190] sm:$0xff]  ;;  %v4225_v18 = vld [vmem:[%s6169_s1 + $0x198] sm:$0xff]  ;;  %p5363_p0 = scmp.ne.s32.totalorder %s4180_s27, %s5362_s28  ;;  %p5368_p2 = scmp.lt.s32.totalorder %s5362_s28, %s5362_s28 }
  0x27   :  { %5100 = vmatprep.subr.bf16.mxu1 %v5099_v61  ;;  %4703 = vmatprep.mubr.msk.f32.mxu0 %vm55_vm0, %v5446_v11  ;;  %v5127_v16 = vpack.c.bf16 %v4227_v14, %v4226_v13  ;;  %v4228_v19 = vld [vmem:[%s6169_s1 + $0x1b0] sm:$0xff]  ;;  %v4229_v20 = vld [vmem:[%s6169_s1 + $0x1b8] sm:$0xff]  ;;  %v5123_v21 = vpack.c.bf16 %v4225_v18, %v4224_v17  ;;  %v4230_v24 = vld [vmem:[%s6169_s1 + $0x1c0] sm:$0xff] }
  0x28   :  { %4714 = vmatprep.mubr.msk.f32.mxu1 %vm55_vm0, %v5446_v11  ;;  %v5131_v22 = vpack.c.bf16 %v4229_v20, %v4228_v19  ;;  %v4231_v25 = vld [vmem:[%s6169_s1 + $0x1c8] sm:$0xff]  ;;  %v4234_v26 = vld [vmem:[%s6169_s1 + $0x1e0] sm:$0xff]  ;;  %v4232_v30 = vld [vmem:[%s6169_s1 + $0x1d0] sm:$0xff]  ;;  %p5369_p3 = por %p5368_p2, %p5367_p1 }
  0x29   :  { %5094 = vmatpush3.bf16.msra.mxu0 %v5091_v60  ;;  %v4235_v27 = vld [vmem:[%s6169_s1 + $0x1e8] sm:$0xff]  ;;  %v5135_v28 = vpack.c.bf16 %v4231_v25, %v4230_v24  ;;  %v4233_v31 = vld [vmem:[%s6169_s1 + $0x1d8] sm:$0xff]  ;;  %v4236_v32 = vld [vmem:[%s6169_s1 + $0x1f0] sm:$0xff] }
  0x2a   :  { %5102 = vmatpush3.bf16.msra.mxu1 %v5099_v61  ;;  %5104 = vmatprep.subr.bf16.mxu0 %v5103_v2  ;;  %v5143_v29 = vpack.c.bf16 %v4235_v27, %v4234_v26  ;;  %v4237_v33 = vld [vmem:[%s6169_s1 + $0x1f8] sm:$0xff]  ;;  %v5139_v34 = vpack.c.bf16 %v4233_v31, %v4232_v30  ;;  %v4254_v36 = vld [vmem:[%s6169_s1 + $0x200] sm:$0xff]  ;;  %v4255_v37 = vld [vmem:[%s6169_s1 + $0x208] sm:$0xff]  ;;  %p5370_p4 = pnand %p5369_p3, %p5363_p0 }
  0x2b   :  { %5112 = vmatprep.subr.bf16.mxu1 %v5111_v3  ;;  %v5147_v35 = vpack.c.bf16 %v4237_v33, %v4236_v32  ;;  %v4258_v38 = vld [vmem:[%s6169_s1 + $0x220] sm:$0xff]  ;;  %v4259_v39 = vld [vmem:[%s6169_s1 + $0x228] sm:$0xff]  ;;  %v5151_v40 = vpack.c.bf16 %v4255_v37, %v4254_v36  ;;  %v4256_v41 = vld [vmem:[%s6169_s1 + $0x210] sm:$0xff] }
  0x2c   :  { %4704 = vmatmul.mubr.msk.f32.vlgmr.msra.gmra.mrb[8].mxu0 %vm55_vm0, %v5479_v23  ;;  %v4257_v42 = vld [vmem:[%s6169_s1 + $0x218] sm:$0xff]  ;;  %v5159_v43 = vpack.c.bf16 %v4259_v39, %v4258_v38  ;;  %v4260_v44 = vld [vmem:[%s6169_s1 + $0x230] sm:$0xff]  ;;  %v4262_v48 = vld [vmem:[%s6169_s1 + $0x240] sm:$0xff] }
  0x2d   :  { %4715 = vmatmul.mubr.msk.f32.vlgmr.msra.gmra.mrb[8].mxu1 %vm55_vm0, %v5479_v23  ;;  %5106 = vmatpush3.bf16.msra.mxu0 %v5103_v2  ;;  %v4261_v45 = vld [vmem:[%s6169_s1 + $0x238] sm:$0xff]  ;;  %v5155_v46 = vpack.c.bf16 %v4257_v42, %v4256_v41  ;;  %v4263_v49 = vld [vmem:[%s6169_s1 + $0x248] sm:$0xff]  ;;  %v4266_v50 = vld [vmem:[%s6169_s1 + $0x260] sm:$0xff] }
  0x2e   :  { %5114 = vmatpush3.bf16.msra.mxu1 %v5111_v3  ;;  %5108 = vmatprep.subr.bf16.mxu0 %v5107_v8  ;;  %v5163_v47 = vpack.c.bf16 %v4261_v45, %v4260_v44  ;;  %v4267_v51 = vld [vmem:[%s6169_s1 + $0x268] sm:$0xff]  ;;  %v5167_v52 = vpack.c.bf16 %v4263_v49, %v4262_v48  ;;  %v4264_v53 = vld [vmem:[%s6169_s1 + $0x250] sm:$0xff]  ;;  %v4265_v54 = vld [vmem:[%s6169_s1 + $0x258] sm:$0xff] }
  0x2f   :  { %5116 = vmatprep.subr.bf16.mxu1 %v5115_v9  ;;  %4725 = vmatprep.mubr.msk.f32.mxu0 %vm55_vm0, %v5446_v11  ;;  %v5175_v55 = vpack.c.bf16 %v4267_v51, %v4266_v50  ;;  %v4268_v56 = vld [vmem:[%s6169_s1 + $0x270] sm:$0xff]  ;;  %v4269_v57 = vld [vmem:[%s6169_s1 + $0x278] sm:$0xff]  ;;  %v5171_v58 = vpack.c.bf16 %v4265_v54, %v4264_v53  ;;  %v4270_v60 = vld [vmem:[%s6169_s1 + $0x280] sm:$0xff] }
  0x30   :  { %4736 = vmatprep.mubr.msk.f32.mxu1 %vm55_vm0, %v5446_v11  ;;  %v5179_v59 = vpack.c.bf16 %v4269_v57, %v4268_v56  ;;  %v4271_v61 = vld [vmem:[%s6169_s1 + $0x288] sm:$0xff]  ;;  %v4274_v62 = vld [vmem:[%s6169_s1 + $0x2a0] sm:$0xff]  ;;  %v4272_v1 = vld [vmem:[%s6169_s1 + $0x290] sm:$0xff] }
  0x31   :  { %5110 = vmatpush3.bf16.msra.mxu0 %v5107_v8  ;;  %v4275_v63 = vld [vmem:[%s6169_s1 + $0x2a8] sm:$0xff]  ;;  %v5183_v0 = vpack.c.bf16 %v4271_v61, %v4270_v60  ;;  %v4273_v2 = vld [vmem:[%s6169_s1 + $0x298] sm:$0xff]  ;;  %v4276_v4 = vld [vmem:[%s6169_s1 + $0x2b0] sm:$0xff] }
  0x32   :  { %5118 = vmatpush3.bf16.msra.mxu1 %v5115_v9  ;;  %5120 = vmatprep.subr.bf16.mxu0 %v5119_v15  ;;  %v5191_v3 = vpack.c.bf16 %v4275_v63, %v4274_v62  ;;  %v4277_v5 = vld [vmem:[%s6169_s1 + $0x2b8] sm:$0xff]  ;;  %v5187_v6 = vpack.c.bf16 %v4273_v2, %v4272_v1  ;;  %v4278_v8 = vld [vmem:[%s6169_s1 + $0x2c0] sm:$0xff]  ;;  %v4279_v9 = vld [vmem:[%s6169_s1 + $0x2c8] sm:$0xff] }
  0x33   :  { %5128 = vmatprep.subr.bf16.mxu1 %v5127_v16  ;;  %v5195_v7 = vpack.c.bf16 %v4277_v5, %v4276_v4  ;;  %v4282_v10 = vld [vmem:[%s6169_s1 + $0x2e0] sm:$0xff]  ;;  %v4283_v12 = vld [vmem:[%s6169_s1 + $0x2e8] sm:$0xff]  ;;  %v5199_v13 = vpack.c.bf16 %v4279_v9, %v4278_v8  ;;  %v4280_v14 = vld [vmem:[%s6169_s1 + $0x2d0] sm:$0xff] }
  0x34   :  { %4726 = vmatmul.mubr.msk.f32.vlgmr.msra.gmra.mrb[10].mxu0 %vm55_vm0, %v5479_v23  ;;  %v4284_v18 = vld [vmem:[%s6169_s1 + $0x2f0] sm:$0xff]  ;;  %v4285_v19 = vld [vmem:[%s6169_s1 + $0x2f8] sm:$0xff]  ;;  %vm5821_vm2 = vmpackc.low %vm1930_vm1, %vm1930_vm1 }
  0x35   :  { %4737 = vmatmul.mubr.msk.f32.vlgmr.msra.gmra.mrb[10].mxu1 %vm55_vm0, %v5479_v23  ;;  %5122 = vmatpush3.bf16.msra.mxu0 %v5119_v15  ;;  %v4281_v15 = vld [vmem:[%s6169_s1 + $0x2d8] sm:$0xff]  ;;  %v5211_v20 = vpack.c.bf16 %v4285_v19, %v4284_v18 }
  0x36   :  { %5130 = vmatpush3.bf16.msra.mxu1 %v5127_v16  ;;  %5124 = vmatprep.subr.bf16.mxu0 %v5123_v21  ;;  %v5207_v16 = vpack.c.bf16 %v4283_v12, %v4282_v10  ;;  %v5203_v17 = vpack.c.bf16 %v4281_v15, %v4280_v14 }
  0x37   :  { %5132 = vmatprep.subr.bf16.mxu1 %v5131_v22  ;;  %4747 = vmatprep.mubr.msk.f32.mxu0 %vm55_vm0, %v5446_v11 }
  0x38   :  { %4758 = vmatprep.mubr.msk.f32.mxu1 %vm55_vm0, %v5446_v11 }
  0x39   :  { %5126 = vmatpush3.bf16.msra.mxu0 %v5123_v21 }
  0x3a   :  { %5134 = vmatpush3.bf16.msra.mxu1 %v5131_v22  ;;  %5136 = vmatprep.subr.bf16.mxu0 %v5135_v28 }
  0x3b   :  { %5144 = vmatprep.subr.bf16.mxu1 %v5143_v29 }
  0x3c   :  { %4748 = vmatmul.mubr.msk.f32.vlgmr.msra.gmra.mrb[12].mxu0 %vm55_vm0, %v5479_v23 }
  0x3d   :  { %4759 = vmatmul.mubr.msk.f32.vlgmr.msra.gmra.mrb[12].mxu1 %vm55_vm0, %v5479_v23  ;;  %5138 = vmatpush3.bf16.msra.mxu0 %v5135_v28 }
  0x3e   :  { %5146 = vmatpush3.bf16.msra.mxu1 %v5143_v29  ;;  %5140 = vmatprep.subr.bf16.mxu0 %v5139_v34 }
  0x3f   :  { %5148 = vmatprep.subr.bf16.mxu1 %v5147_v35  ;;  %4769 = vmatprep.mubr.msk.f32.mxu0 %vm55_vm0, %v5446_v11 }
  0x40   :  { %4780 = vmatprep.mubr.msk.f32.mxu1 %vm55_vm0, %v5446_v11 }
  0x41   :  { %5142 = vmatpush3.bf16.msra.mxu0 %v5139_v34 }
  0x42   :  { %5150 = vmatpush3.bf16.msra.mxu1 %v5147_v35  ;;  %5152 = vmatprep.subr.bf16.mxu0 %v5151_v40 }
  0x43   :  { %5160 = vmatprep.subr.bf16.mxu1 %v5159_v43 }
  0x44   :  { %4770 = vmatmul.mubr.msk.f32.vlgmr.msra.gmra.mrb[14].mxu0 %vm55_vm0, %v5479_v23 }
  0x45   :  { %4781 = vmatmul.mubr.msk.f32.vlgmr.msra.gmra.mrb[14].mxu1 %vm55_vm0, %v5479_v23  ;;  %5154 = vmatpush3.bf16.msra.mxu0 %v5151_v40 }
  0x46   :  { %5156 = vmatprep.subr.bf16.mxu0 %v5155_v46  ;;  %5162 = vmatpush3.bf16.msra.mxu1 %v5159_v43 }
  0x47   :  { %4791 = vmatprep.mubr.msk.f32.mxu0 %vm55_vm0, %v5446_v11  ;;  %5164 = vmatprep.subr.bf16.mxu1 %v5163_v47 }
  0x48   :  { %4802 = vmatprep.mubr.msk.f32.mxu1 %vm55_vm0, %v5446_v11 }
  0x49   :  { %5158 = vmatpush3.bf16.msra.mxu0 %v5155_v46 }
  0x4a   :  { %5168 = vmatprep.subr.bf16.mxu0 %v5167_v52  ;;  %5166 = vmatpush3.bf16.msra.mxu1 %v5163_v47 }
  0x4b   :  { %5176 = vmatprep.subr.bf16.mxu1 %v5175_v55 }
  0x4c   :  { %4792 = vmatmul.mubr.msk.f32.vlgmr.msra.gmra.mrb[16].mxu0 %vm55_vm0, %v5479_v23 }
  0x4d   :  { %5170 = vmatpush3.bf16.msra.mxu0 %v5167_v52  ;;  %4803 = vmatmul.mubr.msk.f32.vlgmr.msra.gmra.mrb[16].mxu1 %vm55_vm0, %v5479_v23 }
  0x4e   :  { %5172 = vmatprep.subr.bf16.mxu0 %v5171_v58  ;;  %5178 = vmatpush3.bf16.msra.mxu1 %v5175_v55 }
  0x4f   :  { %4813 = vmatprep.mubr.msk.f32.mxu0 %vm55_vm0, %v5446_v11  ;;  %5180 = vmatprep.subr.bf16.mxu1 %v5179_v59 }
  0x50   :  { %4824 = vmatprep.mubr.msk.f32.mxu1 %vm55_vm0, %v5446_v11 }
  0x51   :  { %5174 = vmatpush3.bf16.msra.mxu0 %v5171_v58 }
  0x52   :  { %5184 = vmatprep.subr.bf16.mxu0 %v5183_v0  ;;  %5182 = vmatpush3.bf16.msra.mxu1 %v5179_v59 }
  0x53   :  { %5192 = vmatprep.subr.bf16.mxu1 %v5191_v3 }
  0x54   :  { %4814 = vmatmul.mubr.msk.f32.vlgmr.msra.gmra.mrb[18].mxu0 %vm55_vm0, %v5479_v23 }
  0x55   :  { %5186 = vmatpush3.bf16.msra.mxu0 %v5183_v0  ;;  %4825 = vmatmul.mubr.msk.f32.vlgmr.msra.gmra.mrb[18].mxu1 %vm55_vm0, %v5479_v23 }
  0x56   :  { %5188 = vmatprep.subr.bf16.mxu0 %v5187_v6  ;;  %5194 = vmatpush3.bf16.msra.mxu1 %v5191_v3 }
  0x57   :  { %4835 = vmatprep.mubr.msk.f32.mxu0 %vm55_vm0, %v5446_v11  ;;  %5196 = vmatprep.subr.bf16.mxu1 %v5195_v7 }
  0x58   :  { %4846 = vmatprep.mubr.msk.f32.mxu1 %vm55_vm0, %v5446_v11 }
  0x59   :  { %5190 = vmatpush3.bf16.msra.mxu0 %v5187_v6 }
  0x5a   :  { %5200 = vmatprep.subr.bf16.mxu0 %v5199_v13  ;;  %5198 = vmatpush3.bf16.msra.mxu1 %v5195_v7 }
  0x5b   :  { %5208 = vmatprep.subr.bf16.mxu1 %v5207_v16 }
  0x5c   :  { %4836 = vmatmul.mubr.msk.f32.vlgmr.msra.gmra.mrb[20].mxu0 %vm55_vm0, %v5479_v23 }
  0x5d   :  { %5202 = vmatpush3.bf16.msra.mxu0 %v5199_v13  ;;  %4847 = vmatmul.mubr.msk.f32.vlgmr.msra.gmra.mrb[20].mxu1 %vm55_vm0, %v5479_v23 }
  0x5e   :  { %5204 = vmatprep.subr.bf16.mxu0 %v5203_v17  ;;  %5210 = vmatpush3.bf16.msra.mxu1 %v5207_v16 }
  0x5f   :  { %4857 = vmatprep.mubr.msk.f32.mxu0 %vm55_vm0, %v5446_v11  ;;  %4868 = vmatprep.mubr.msk.f32.mxu1 %vm55_vm0, %v5446_v11 }
  0x60   :  { %5212 = vmatprep.subr.bf16.mxu1 %v5211_v20 }
  0x61   :  { %5206 = vmatpush3.bf16.msra.mxu0 %v5203_v17 }
  0x62   :  { %5214 = vmatpush3.bf16.msra.mxu1 %v5211_v20 }
  0x64   :  { %4858 = vmatmul.mubr.msk.f32.vlgmr.msra.gmra.mrb[22].mxu0 %vm55_vm0, %v5479_v23 }
  0x65   :  { %4869 = vmatmul.mubr.msk.f32.vlgmr.msra.gmra.mrb[22].mxu1 %vm55_vm0, %v5479_v23 }
  0xdf   :  { %v4617_v21 = vpop.f32.mrb[0].mxu0 }
  0xe0   :  { %v128_v22 = vpop.f32.mrb[1].mxu0  ;;  %v4628_v24 = vpop.f32.mrb[0].mxu1 }
  0xe1   :  { %4875 = vmatprep.mubr.msk.f32.mxu0 %vm1930_vm1, %v128_v22  ;;  %v203_v25 = vpop.f32.mrb[1].mxu1  ;;  %v1929_v22 = vld [vmem:[%s6172_s4 + $0x8] sm:$0xff] }
  0xe2   :  { %4882 = vmatprep.mubr.msk.f32.mxu1 %vm1930_vm1, %v203_v25  ;;  %v1928_v25 = vld [vmem:[%s6172_s4] sm:$0xff] }
  0xe7   :  { %v4639_v26 = vpop.f32.mrb[2].mxu0 }
  0xe8   :  { %v278_v11 = vpop.f32.mrb[3].mxu0  ;;  %v4650_v27 = vpop.f32.mrb[2].mxu1 }
  0xe9   :  { %v353_v28 = vpop.f32.mrb[3].mxu1 }
  0xef   :  { %v4661_v29 = vpop.f32.mrb[4].mxu0 }
  0xf0   :  { %v428_v30 = vpop.f32.mrb[5].mxu0  ;;  %v4672_v31 = vpop.f32.mrb[4].mxu1 }
  0xf1   :  { %v503_v32 = vpop.f32.mrb[5].mxu1 }
  0xf7   :  { %v5815_v33 = vpop.f32.mrb[6].mxu0 }
  0xf8   :  { %v578_v23 = vpop.f32.mrb[7].mxu0  ;;  %v5817_v34 = vpop.f32.mrb[6].mxu1 }
  0xf9   :  { %v653_v35 = vpop.f32.mrb[7].mxu1 }
  0xff   :  { %v4705_v36 = vpop.f32.mrb[8].mxu0 }
 0x100   :  { %v4716_v37 = vpop.f32.mrb[8].mxu1  ;;  %v761_v38 = vpop.f32.mrb[9].mxu0 }
 0x101   :  { %v5215_v40 = vpack.c.bf16 %v4705_v36, %v761_v38  ;;  %v836_v41 = vpop.f32.mrb[9].mxu1 }
 0x102   :  { %v5221_v42 = vpack.c.bf16 %v4716_v37, %v836_v41 }
 0x103   :  { %5217 = vmatprep.subr.msk.bf16.mxu0 %vm5821_vm2, %v5215_v40 }
 0x104   :  { %5223 = vmatprep.subr.msk.bf16.mxu1 %vm5821_vm2, %v5221_v42  ;;  %5220 = vmatpush3.bf16.xpose.msk.msra.mxu0 %vm5821_vm2, %v5215_v40 }
 0x105   :  { %5226 = vmatpush3.bf16.xpose.msk.msra.mxu1 %vm5821_vm2, %v5221_v42 }
 0x107   :  { %v4727_v43 = vpop.f32.mrb[10].mxu0 }
 0x108   :  { %v4738_v44 = vpop.f32.mrb[10].mxu1  ;;  %v911_v45 = vpop.f32.mrb[11].mxu0 }
 0x109   :  { %v5227_v46 = vpack.c.bf16 %v4727_v43, %v911_v45  ;;  %v986_v47 = vpop.f32.mrb[11].mxu1 }
 0x10a   :  { %v5233_v48 = vpack.c.bf16 %v4738_v44, %v986_v47 }
 0x10b   :  { %4876 = vmatmul.mubr.msk.f32.vlgmr.msra.gmra.mrb[24].mxu0 %vm1930_vm1, %v4617_v21  ;;  %5229 = vmatprep.subr.msk.bf16.mxu0 %vm5821_vm2, %v5227_v46 }
 0x10c   :  { %4883 = vmatmul.mubr.msk.f32.vlgmr.msra.gmra.mrb[24].mxu1 %vm1930_vm1, %v4628_v24  ;;  %5235 = vmatprep.subr.msk.bf16.mxu1 %vm5821_vm2, %v5233_v48 }
 0x10d   :  { %5232 = vmatpush3.bf16.xpose.msk.msra.mxu0 %vm5821_vm2, %v5227_v46  ;;  %4889 = vmatprep.mubr.msk.f32.mxu0 %vm1930_vm1, %v278_v11 }
 0x10e   :  { %5238 = vmatpush3.bf16.xpose.msk.msra.mxu1 %vm5821_vm2, %v5233_v48  ;;  %4896 = vmatprep.mubr.msk.f32.mxu1 %vm1930_vm1, %v353_v28 }
 0x10f   :  { %v4749_v49 = vpop.f32.mrb[12].mxu0 }
 0x110   :  { %v4760_v50 = vpop.f32.mrb[12].mxu1  ;;  %v1061_v51 = vpop.f32.mrb[13].mxu0 }
 0x111   :  { %v5239_v52 = vpack.c.bf16 %v4749_v49, %v1061_v51  ;;  %v1136_v53 = vpop.f32.mrb[13].mxu1 }
 0x112   :  { %v5245_v54 = vpack.c.bf16 %v4760_v50, %v1136_v53 }
 0x113   :  { %5241 = vmatprep.subr.msk.bf16.mxu0 %vm5821_vm2, %v5239_v52 }
 0x114   :  { %4890 = vmatmul.mubr.msk.f32.vlgmr.msra.gmra.mrb[26].mxu0 %vm1930_vm1, %v4639_v26  ;;  %5247 = vmatprep.subr.msk.bf16.mxu1 %vm5821_vm2, %v5245_v54 }
 0x115   :  { %4897 = vmatmul.mubr.msk.f32.vlgmr.msra.gmra.mrb[26].mxu1 %vm1930_vm1, %v4650_v27  ;;  %5244 = vmatpush3.bf16.xpose.msk.msra.mxu0 %vm5821_vm2, %v5239_v52 }
 0x116   :  { %4903 = vmatprep.mubr.msk.f32.mxu0 %vm1930_vm1, %v428_v30  ;;  %5250 = vmatpush3.bf16.xpose.msk.msra.mxu1 %vm5821_vm2, %v5245_v54 }
 0x117   :  { %4910 = vmatprep.mubr.msk.f32.mxu1 %vm1930_vm1, %v503_v32  ;;  %v4771_v55 = vpop.f32.mrb[14].mxu0 }
 0x118   :  { %v4782_v56 = vpop.f32.mrb[14].mxu1  ;;  %v1211_v57 = vpop.f32.mrb[15].mxu0 }
 0x119   :  { %v5251_v58 = vpack.c.bf16 %v4771_v55, %v1211_v57  ;;  %v1286_v59 = vpop.f32.mrb[15].mxu1 }
 0x11a   :  { %v5257_v60 = vpack.c.bf16 %v4782_v56, %v1286_v59 }
 0x11b   :  { %5253 = vmatprep.subr.msk.bf16.mxu0 %vm5821_vm2, %v5251_v58 }
 0x11c   :  { %4904 = vmatmul.mubr.msk.f32.vlgmr.msra.gmra.mrb[28].mxu0 %vm1930_vm1, %v4661_v29  ;;  %5259 = vmatprep.subr.msk.bf16.mxu1 %vm5821_vm2, %v5257_v60 }
 0x11d   :  { %4911 = vmatmul.mubr.msk.f32.vlgmr.msra.gmra.mrb[28].mxu1 %vm1930_vm1, %v4672_v31  ;;  %5256 = vmatpush3.bf16.xpose.msk.msra.mxu0 %vm5821_vm2, %v5251_v58 }
 0x11e   :  { %4917 = vmatprep.mubr.msk.f32.mxu0 %vm1930_vm1, %v578_v23  ;;  %5262 = vmatpush3.bf16.xpose.msk.msra.mxu1 %vm5821_vm2, %v5257_v60 }
 0x11f   :  { %4924 = vmatprep.mubr.msk.f32.mxu1 %vm1930_vm1, %v653_v35  ;;  %v4793_v61 = vpop.f32.mrb[16].mxu0 }
 0x120   :  { %v1394_v62 = vpop.f32.mrb[17].mxu0  ;;  %v4804_v63 = vpop.f32.mrb[16].mxu1 }
 0x121   :  { %v5263_v0 = vpack.c.bf16 %v4793_v61, %v1394_v62  ;;  %v1469_v1 = vpop.f32.mrb[17].mxu1 }
 0x122   :  { %v5267_v2 = vpack.c.bf16 %v4804_v63, %v1469_v1 }
 0x123   :  { %5264 = vmatprep.subr.bf16.mxu0 %v5263_v0 }
 0x124   :  { %4918 = vmatmul.mubr.msk.f32.vlgmr.msra.gmra.mrb[30].mxu0 %vm1930_vm1, %v5815_v33  ;;  %5268 = vmatprep.subr.bf16.mxu1 %v5267_v2 }
 0x125   :  { %4925 = vmatmul.mubr.msk.f32.vlgmr.msra.gmra.mrb[30].mxu1 %vm1930_vm1, %v5817_v34  ;;  %5266 = vmatpush3.bf16.msra.mxu0 %v5263_v0 }
 0x126   :  { %5270 = vmatpush3.bf16.msra.mxu1 %v5267_v2 }
 0x127   :  { %v4815_v3 = vpop.f32.mrb[18].mxu0 }
 0x128   :  { %v1544_v4 = vpop.f32.mrb[19].mxu0  ;;  %v4826_v5 = vpop.f32.mrb[18].mxu1 }
 0x129   :  { %v5873_v6 = vpack.c.bf16 %v4815_v3, %v1544_v4  ;;  %v1619_v7 = vpop.f32.mrb[19].mxu1 }
 0x12a   :  { %v5875_v8 = vpack.c.bf16 %v4826_v5, %v1619_v7 }
 0x12b   :  { %5272 = vmatprep.subr.bf16.mxu0 %v5873_v6 }
 0x12c   :  { %5276 = vmatprep.subr.bf16.mxu1 %v5875_v8 }
 0x12f   :  { %v4837_v9 = vpop.f32.mrb[20].mxu0 }
 0x130   :  { %v1694_v10 = vpop.f32.mrb[21].mxu0  ;;  %v4848_v12 = vpop.f32.mrb[20].mxu1 }
 0x131   :  { %v5879_v13 = vpack.c.bf16 %v4837_v9, %v1694_v10  ;;  %v1769_v14 = vpop.f32.mrb[21].mxu1 }
 0x132   :  { %v5881_v15 = vpack.c.bf16 %v4848_v12, %v1769_v14 }
 0x137   :  { %v4859_v16 = vpop.f32.mrb[22].mxu0 }
 0x138   :  { %v1844_v17 = vpop.f32.mrb[23].mxu0  ;;  %v4870_v18 = vpop.f32.mrb[22].mxu1 }
 0x139   :  { %v5883_v19 = vpack.c.bf16 %v4859_v16, %v1844_v17  ;;  %v1919_v20 = vpop.f32.mrb[23].mxu1 }
 0x13a   :  { %v5885_v21 = vpack.c.bf16 %v4870_v18, %v1919_v20 }
 0x1de   :  { %v4877_v24 = vpop.f32.mrb[24].mxu0 }
 0x1df   :  { %v5893_v26 = vadd.f32 %v4877_v24, %v1929_v22  ;;  %v4884_v11 = vpop.f32.mrb[24].mxu1  ;;  %v2009_v27 = vpop.f32.mrb[25].mxu0 }
 0x1e0   :  { %v5895_v28 = vadd.f32 %v4884_v11, %v1929_v22  ;;  %v2096_v29 = vpop.f32.mrb[25].mxu1  ;;  %v5897_v30 = vadd.f32 %v2009_v27, %v1928_v25 }
 0x1e1   :  { %v2631_v31 = vsel %vm2627_vm3, %v5893_v26, -inf  ;;  %v5901_v32 = vadd.f32 %v2096_v29, %v1928_v25 }
 0x1e2   :  { %v2637_v33 = vsel %vm2627_vm3, %v5895_v28, -inf  ;;  %2632 = vmax.xlane.f32.xlu0 %v2631_v31  ;;  %v2628_v23 = vsel %vm2627_vm3, %v5897_v30, -inf }
 0x1e3   :  { %2638 = vmax.xlane.f32.xlu1 %v2637_v33  ;;  %v2634_v34 = vsel %vm2627_vm3, %v5901_v32, -inf }
 0x1e6   :  { %2629 = vmax.xlane.f32.xlu0 %v2628_v23 }
 0x1e7   :  { %2635 = vmax.xlane.f32.xlu1 %v2634_v34  ;;  %v4891_v35 = vpop.f32.mrb[26].mxu0 }
 0x1e8   :  { %v4898_v36 = vpop.f32.mrb[26].mxu1  ;;  %v5909_v37 = vadd.f32 %v4891_v35, %v1929_v22  ;;  %v2183_v38 = vpop.f32.mrb[27].mxu0 }
 0x1e9   :  { %v5911_v39 = vadd.f32 %v2183_v38, %v1928_v25  ;;  %v2270_v40 = vpop.f32.mrb[27].mxu1  ;;  %v5913_v41 = vadd.f32 %v4898_v36, %v1929_v22 }
 0x1ea   :  { %v2643_v42 = vsel %vm2627_vm3, %v5909_v37, -inf  ;;  %v5917_v43 = vadd.f32 %v2270_v40, %v1928_v25 }
 0x1eb   :  { %2644 = vmax.xlane.f32.xlu1 %v2643_v42  ;;  %v2640_v44 = vsel %vm2627_vm3, %v5911_v39, -inf  ;;  %v2649_v45 = vsel %vm2627_vm3, %v5913_v41, -inf }
 0x1ec   :  { %2641 = vmax.xlane.f32.xlu0 %v2640_v44  ;;  %v2646_v47 = vsel %vm2627_vm3, %v5917_v43, -inf }
 0x1ef   :  { %2650 = vmax.xlane.f32.xlu1 %v2649_v45  ;;  %v4905_v46 = vpop.f32.mrb[28].mxu0 }
 0x1f0   :  { %v4912_v48 = vpop.f32.mrb[28].mxu1  ;;  %v5925_v49 = vadd.f32 %v4905_v46, %v1929_v22  ;;  %v2357_v50 = vpop.f32.mrb[29].mxu0  ;;  %2647 = vmax.xlane.f32.xlu0 %v2646_v47 }
 0x1f1   :  { %v5927_v51 = vadd.f32 %v2357_v50, %v1928_v25  ;;  %v2444_v52 = vpop.f32.mrb[29].mxu1  ;;  %v5929_v53 = vadd.f32 %v4912_v48, %v1929_v22 }
 0x1f2   :  { %v2655_v54 = vsel %vm2627_vm3, %v5925_v49, -inf  ;;  %v5933_v55 = vadd.f32 %v2444_v52, %v1928_v25 }
 0x1f3   :  { %2656 = vmax.xlane.f32.xlu1 %v2655_v54  ;;  %v2652_v56 = vsel %vm2627_vm3, %v5927_v51, -inf  ;;  %v2661_v57 = vsel %vm2627_vm3, %v5929_v53, -inf }
 0x1f4   :  { %2653 = vmax.xlane.f32.xlu0 %v2652_v56  ;;  %v2658_v59 = vsel %vm2627_vm3, %v5933_v55, -inf }
 0x1f7   :  { %2662 = vmax.xlane.f32.xlu1 %v2661_v57  ;;  %v4919_v58 = vpop.f32.mrb[30].mxu0 }
 0x1f8   :  { %v4926_v60 = vpop.f32.mrb[30].mxu1  ;;  %v5941_v61 = vadd.f32 %v4919_v58, %v1929_v22  ;;  %v2531_v62 = vpop.f32.mrb[31].mxu0  ;;  %2659 = vmax.xlane.f32.xlu0 %v2658_v59 }
 0x1f9   :  { %v5943_v63 = vadd.f32 %v2531_v62, %v1928_v25  ;;  %v2618_v0 = vpop.f32.mrb[31].mxu1  ;;  %v5945_v1 = vadd.f32 %v4926_v60, %v1929_v22 }
 0x1fa   :  { %v2667_v2 = vsel %vm2627_vm3, %v5941_v61, -inf  ;;  %v5949_v3 = vadd.f32 %v2618_v0, %v1928_v25 }
 0x1fb   :  { %2668 = vmax.xlane.f32.xlu1 %v2667_v2  ;;  %v2664_v4 = vsel %vm2627_vm3, %v5943_v63, -inf  ;;  %v2673_v5 = vsel %vm2627_vm3, %v5945_v1, -inf }
 0x1fc   :  { %2665 = vmax.xlane.f32.xlu0 %v2664_v4  ;;  %v2670_v7 = vsel %vm2627_vm3, %v5949_v3, -inf }
 0x1ff   :  { %2674 = vmax.xlane.f32.xlu1 %v2673_v5 }
 0x200   :  { %2671 = vmax.xlane.f32.xlu0 %v2670_v7 }
 0x26f   :  { %v2633_v9 = vpop.xlane.xlu0 %2632 }
 0x270   :  { %v2639_v10 = vpop.xlane.xlu1 %2638  ;;  %v2677_v12 = vsub.f32 %v5893_v26, %v2633_v9 }
 0x271   :  { %v2679_v14 = vsub.f32 %v5895_v28, %v2639_v10 }
 0x272   :  { %v2694_v16 = vmul.f32 1.442695, %v2677_v12 }
 0x273   :  { %v2698_v17 = vmul.f32 1.442695, %v2679_v14  ;;  %v2630_v18 = vpop.xlane.xlu0 %2629 }
 0x274   :  { %5298 = vpow2.f32 %v2694_v16  ;;  %v2636_v20 = vpop.xlane.xlu1 %2635  ;;  %v2676_v22 = vsub.f32 %v5897_v30, %v2630_v18 }
 0x275   :  { %v2678_v24 = vsub.f32 %v5901_v32, %v2636_v20  ;;  %5300 = vpow2.f32 %v2698_v17 }
 0x276   :  { %v2692_v25 = vmul.f32 1.442695, %v2676_v22 }
 0x277   :  { %v2696_v11 = vmul.f32 1.442695, %v2678_v24 }
 0x278   :  { %5302 = vpow2.f32 %v2692_v25  ;;  %v2645_v27 = vpop.xlane.xlu1 %2644 }
 0x279   :  { %v2681_v29 = vsub.f32 %v5909_v37, %v2645_v27  ;;  %v2642_v31 = vpop.xlane.xlu0 %2641  ;;  %5304 = vpow2.f32 %v2696_v11 }
 0x27a   :  { %v2680_v26 = vsub.f32 %v5911_v39, %v2642_v31 }
 0x27b   :  { %v2702_v28 = vmul.f32 1.442695, %v2681_v29 }
 0x27c   :  { %v2700_v33 = vmul.f32 1.442695, %v2680_v26  ;;  %v2651_v23 = vpop.xlane.xlu1 %2650 }
 0x27d   :  { %5306 = vpow2.f32 %v2702_v28  ;;  %v2683_v34 = vsub.f32 %v5913_v41, %v2651_v23  ;;  %v2648_v30 = vpop.xlane.xlu0 %2647 }
 0x27e   :  { %v5964_v35 = vpop.eup %5298  ;;  %5308 = vpow2.f32 %v2700_v33  ;;  %v2682_v32 = vsub.f32 %v5917_v43, %v2648_v30 }
 0x27f   :  { %v2706_v36 = vmul.f32 1.442695, %v2683_v34  ;;  %v2727_v37 = vsel %vm2627_vm3, %v5964_v35, 0.0  ;;  %v5969_v38 = vpop.eup %5300 }
 0x280   :  { %v2704_v40 = vmul.f32 1.442695, %v2682_v32  ;;  %v2657_v39 = vpop.xlane.xlu1 %2656  ;;  %2728 = vadd.xlane.f32.xlu1 %v2727_v37  ;;  %v2733_v43 = vsel %vm2627_vm3, %v5969_v38, 0.0 }
 0x281   :  { %5310 = vpow2.f32 %v2706_v36  ;;  %v2685_v42 = vsub.f32 %v5925_v49, %v2657_v39  ;;  %v2654_v44 = vpop.xlane.xlu0 %2653 }
 0x282   :  { %v5972_v41 = vpop.eup %5302  ;;  %5312 = vpow2.f32 %v2704_v40  ;;  %v2684_v45 = vsub.f32 %v5927_v51, %v2654_v44 }
 0x283   :  { %v2710_v46 = vmul.f32 1.442695, %v2685_v42  ;;  %v2724_v47 = vsel %vm2627_vm3, %v5972_v41, 0.0  ;;  %v5979_v48 = vpop.eup %5304 }
 0x284   :  { %v2708_v50 = vmul.f32 1.442695, %v2684_v45  ;;  %v2663_v52 = vpop.xlane.xlu1 %2662  ;;  %2734 = vadd.xlane.f32.xlu1 %v2733_v43  ;;  %2725 = vadd.xlane.f32.xlu0 %v2724_v47  ;;  %v2730_v58 = vsel %vm2627_vm3, %v5979_v48, 0.0 }
 0x285   :  { %5314 = vpow2.f32 %v2710_v46  ;;  %v2687_v49 = vsub.f32 %v5929_v53, %v2663_v52  ;;  %v2660_v54 = vpop.xlane.xlu0 %2659 }
 0x286   :  { %5316 = vpow2.f32 %v2708_v50  ;;  %v2686_v51 = vsub.f32 %v5933_v55, %v2660_v54 }
 0x287   :  { %v5983_v56 = vpop.eup %5306  ;;  %v2714_v57 = vmul.f32 1.442695, %v2687_v49 }
 0x288   :  { %v5987_v59 = vpop.eup %5308  ;;  %v2712_v60 = vmul.f32 1.442695, %v2686_v51  ;;  %v2669_v62 = vpop.xlane.xlu1 %2668  ;;  %v2739_v0 = vsel %vm2627_vm3, %v5983_v56, 0.0  ;;  %2731 = vadd.xlane.f32.xlu0 %v2730_v58 }
 0x289   :  { %5318 = vpow2.f32 %v2714_v57  ;;  %v2689_v53 = vsub.f32 %v5941_v61, %v2669_v62  ;;  %2740 = vadd.xlane.f32.xlu1 %v2739_v0  ;;  %v2666_v2 = vpop.xlane.xlu0 %2665  ;;  %v2736_v7 = vsel %vm2627_vm3, %v5987_v59, 0.0 }
 0x28a   :  { %5320 = vpow2.f32 %v2712_v60  ;;  %v2688_v55 = vsub.f32 %v5943_v63, %v2666_v2 }
 0x28b   :  { %v5993_v4 = vpop.eup %5310  ;;  %v2718_v5 = vmul.f32 1.442695, %v2689_v53 }
 0x28c   :  { %v5997_v9 = vpop.eup %5312  ;;  %v2716_v10 = vmul.f32 1.442695, %v2688_v55  ;;  %v2675_v12 = vpop.xlane.xlu1 %2674  ;;  %v2745_v14 = vsel %vm2627_vm3, %v5993_v4, 0.0  ;;  %2737 = vadd.xlane.f32.xlu0 %v2736_v7 }
 0x28d   :  { %5322 = vpow2.f32 %v2718_v5  ;;  %v2691_v61 = vsub.f32 %v5945_v1, %v2675_v12  ;;  %2746 = vadd.xlane.f32.xlu1 %v2745_v14  ;;  %v2672_v16 = vpop.xlane.xlu0 %2671  ;;  %v2742_v20 = vsel %vm2627_vm3, %v5997_v9, 0.0 }
 0x28e   :  { %5324 = vpow2.f32 %v2716_v10  ;;  %v2690_v63 = vsub.f32 %v5949_v3, %v2672_v16 }
 0x28f   :  { %v6003_v17 = vpop.eup %5314  ;;  %v2722_v18 = vmul.f32 1.442695, %v2691_v61 }
 0x290   :  { %v6007_v22 = vpop.eup %5316  ;;  %v2720_v24 = vmul.f32 1.442695, %v2690_v63  ;;  %v2751_v25 = vsel %vm2627_vm3, %v6003_v17, 0.0  ;;  %2743 = vadd.xlane.f32.xlu0 %v2742_v20 }
 0x291   :  { %5326 = vpow2.f32 %v2722_v18  ;;  %2752 = vadd.xlane.f32.xlu1 %v2751_v25  ;;  %v2748_v3 = vsel %vm2627_vm3, %v6007_v22, 0.0  ;;  %v3454_v25 = vld [vmem:[%s6170_s2 + $0x8] sm:$0xf] }
 0x292   :  { %5328 = vpow2.f32 %v2720_v24  ;;  %v3453_v24 = vld [vmem:[%s6170_s2 + $0x4] sm:$0xf] }
 0x293   :  { %v6011_v1 = vpop.eup %5318 }
 0x294   :  { %v6015_v11 = vpop.eup %5320  ;;  %v2757_v27 = vsel %vm2627_vm3, %v6011_v1, 0.0  ;;  %2749 = vadd.xlane.f32.xlu0 %v2748_v3 }
 0x295   :  { %2758 = vadd.xlane.f32.xlu1 %v2757_v27  ;;  %v2754_v31 = vsel %vm2627_vm3, %v6015_v11, 0.0  ;;  %v3456_v27 = vld [vmem:[%s6170_s2 + $0x10] sm:$0xf] }
 0x297   :  { %v6019_v29 = vpop.eup %5322 }
 0x298   :  { %v6023_v26 = vpop.eup %5324  ;;  %v2763_v28 = vsel %vm2627_vm3, %v6019_v29, 0.0  ;;  %2755 = vadd.xlane.f32.xlu0 %v2754_v31 }
 0x299   :  { %2764 = vadd.xlane.f32.xlu1 %v2763_v28  ;;  %v2760_v23 = vsel %vm2627_vm3, %v6023_v26, 0.0 }
 0x29b   :  { %v6027_v33 = vpop.eup %5326 }
 0x29c   :  { %v6031_v34 = vpop.eup %5328  ;;  %v2769_v30 = vsel %vm2627_vm3, %v6027_v33, 0.0  ;;  %2761 = vadd.xlane.f32.xlu0 %v2760_v23  ;;  %v3458_v23 = vld [vmem:[%s6170_s2 + $0x18] sm:$0xf] }
 0x29d   :  { %2770 = vadd.xlane.f32.xlu1 %v2769_v30  ;;  %v2766_v32 = vsel %vm2627_vm3, %v6031_v34, 0.0 }
 0x2a0   :  { %2767 = vadd.xlane.f32.xlu0 %v2766_v32  ;;  %v3459_v32 = vld [vmem:[%s6170_s2 + $0x1c] sm:$0xf] }
 0x30d   :  { %v2729_v36 = vpop.xlane.xlu1 %2728 }
 0x30e   :  { %5330 = vrcp.f32 %v2729_v36 }
 0x311   :  { %v2735_v37 = vpop.xlane.xlu1 %2734  ;;  %v2726_v40 = vpop.xlane.xlu0 %2725 }
 0x312   :  { %5332 = vrcp.f32 %v2726_v40 }
 0x313   :  { %5334 = vrcp.f32 %v2735_v37 }
 0x315   :  { %v2732_v39 = vpop.xlane.xlu0 %2731 }
 0x316   :  { %v2741_v42 = vpop.xlane.xlu1 %2740  ;;  %5336 = vrcp.f32 %v2732_v39 }
 0x317   :  { %5338 = vrcp.f32 %v2741_v42 }
 0x318   :  { %v5331_v46 = vpop.eup %5330 }
 0x319   :  { %v2738_v44 = vpop.xlane.xlu0 %2737  ;;  %v2789_v54 = vmul.f32 %v5331_v46, %v5964_v35 }
 0x31a   :  { %v2747_v45 = vpop.xlane.xlu1 %2746  ;;  %5340 = vrcp.f32 %v2738_v44 }
 0x31b   :  { %5342 = vrcp.f32 %v2747_v45 }
 0x31c   :  { %v5333_v43 = vpop.eup %5332 }
 0x31d   :  { %v2744_v47 = vpop.xlane.xlu0 %2743  ;;  %v2788_v52 = vmul.f32 %v5333_v43, %v5972_v41  ;;  %v5335_v49 = vpop.eup %5334 }
 0x31e   :  { %v2753_v50 = vpop.xlane.xlu1 %2752  ;;  %5344 = vrcp.f32 %v2744_v47  ;;  %v2791_v60 = vmul.f32 %v5335_v49, %v5969_v38 }
 0x31f   :  { %4931 = vmatprep.mubr.msk.f32.mxu0 %vm2627_vm3, %v2788_v52  ;;  %5346 = vrcp.f32 %v2753_v50 }
 0x320   :  { %v5337_v51 = vpop.eup %5336  ;;  %4932 = vmatmul.mubr.msk.f32.vlgmr.msra.gmra.mrb[32].mxu0 %vm2627_vm3, %v2789_v54 }
 0x321   :  { %v2750_v57 = vpop.xlane.xlu0 %2749  ;;  %v2790_v58 = vmul.f32 %v5337_v51, %v5979_v48  ;;  %5274 = vmatpush3.bf16.msra.mxu0 %v5873_v6  ;;  %v5339_v0 = vpop.eup %5338 }
 0x322   :  { %v2759_v62 = vpop.xlane.xlu1 %2758  ;;  %5348 = vrcp.f32 %v2750_v57  ;;  %5280 = vmatprep.subr.bf16.mxu0 %v5879_v13  ;;  %v2793_v38 = vmul.f32 %v5339_v0, %v5983_v56 }
 0x323   :  { %4938 = vmatprep.mubr.msk.f32.mxu1 %vm2627_vm3, %v2790_v58  ;;  %5350 = vrcp.f32 %v2759_v62 }
 0x324   :  { %v5341_v35 = vpop.eup %5340  ;;  %4939 = vmatmul.mubr.msk.f32.vlgmr.msra.gmra.mrb[32].mxu1 %vm2627_vm3, %v2791_v60 }
 0x325   :  { %5278 = vmatpush3.bf16.msra.mxu1 %v5875_v8  ;;  %v2756_v41 = vpop.xlane.xlu0 %2755  ;;  %v2792_v48 = vmul.f32 %v5341_v35, %v5987_v59  ;;  %v5343_v6 = vpop.eup %5342 }
 0x326   :  { %v2765_v53 = vpop.xlane.xlu1 %2764  ;;  %5284 = vmatprep.subr.bf16.mxu1 %v5881_v15  ;;  %5352 = vrcp.f32 %v2756_v41  ;;  %v2795_v59 = vmul.f32 %v5343_v6, %v5993_v4 }
 0x327   :  { %4945 = vmatprep.mubr.msk.f32.mxu0 %vm2627_vm3, %v2792_v48  ;;  %5354 = vrcp.f32 %v2765_v53 }
 0x328   :  { %v5345_v2 = vpop.eup %5344  ;;  %4946 = vmatmul.mubr.msk.f32.vlgmr.msra.gmra.mrb[34].mxu0 %vm2627_vm3, %v2793_v38 }
 0x329   :  { %5282 = vmatpush3.bf16.msra.mxu0 %v5879_v13  ;;  %v2762_v55 = vpop.xlane.xlu0 %2761  ;;  %v2794_v8 = vmul.f32 %v5345_v2, %v5997_v9  ;;  %v5347_v56 = vpop.eup %5346 }
 0x32a   :  { %v2771_v5 = vpop.xlane.xlu1 %2770  ;;  %5288 = vmatprep.subr.bf16.mxu0 %v5883_v19  ;;  %5356 = vrcp.f32 %v2762_v55  ;;  %v2797_v9 = vmul.f32 %v5347_v56, %v6003_v17 }
 0x32b   :  { %4952 = vmatprep.mubr.msk.f32.mxu1 %vm2627_vm3, %v2794_v8  ;;  %5358 = vrcp.f32 %v2771_v5 }
 0x32c   :  { %v5349_v7 = vpop.eup %5348  ;;  %4953 = vmatmul.mubr.msk.f32.vlgmr.msra.gmra.mrb[34].mxu1 %vm2627_vm3, %v2795_v59 }
 0x32d   :  { %5286 = vmatpush3.bf16.msra.mxu1 %v5881_v15  ;;  %v2768_v10 = vpop.xlane.xlu0 %2767  ;;  %v2796_v13 = vmul.f32 %v5349_v7, %v6007_v22  ;;  %v5351_v4 = vpop.eup %5350 }
 0x32e   :  { %5292 = vmatprep.subr.bf16.mxu1 %v5885_v21  ;;  %5360 = vrcp.f32 %v2768_v10  ;;  %v2799_v15 = vmul.f32 %v5351_v4, %v6011_v1  ;;  %v3455_v1 = vld [vmem:[%s6170_s2 + $0xc] sm:$0xf] }
 0x32f   :  { %4959 = vmatprep.mubr.msk.f32.mxu0 %vm2627_vm3, %v2796_v13 }
 0x330   :  { %v5353_v12 = vpop.eup %5352  ;;  %4960 = vmatmul.mubr.msk.f32.vlgmr.msra.gmra.mrb[36].mxu0 %vm2627_vm3, %v2797_v9 }
 0x331   :  { %5290 = vmatpush3.bf16.msra.mxu0 %v5883_v19  ;;  %v2798_v14 = vmul.f32 %v5353_v12, %v6015_v11  ;;  %v5355_v61 = vpop.eup %5354 }
 0x332   :  { %v2801_v17 = vmul.f32 %v5355_v61, %v6019_v29 }
 0x333   :  { %4966 = vmatprep.mubr.msk.f32.mxu1 %vm2627_vm3, %v2798_v14 }
 0x334   :  { %v5357_v16 = vpop.eup %5356  ;;  %4967 = vmatmul.mubr.msk.f32.vlgmr.msra.gmra.mrb[36].mxu1 %vm2627_vm3, %v2799_v15 }
 0x335   :  { %5294 = vmatpush3.bf16.msra.mxu1 %v5885_v21  ;;  %v2800_v63 = vmul.f32 %v5357_v16, %v6023_v26  ;;  %v5359_v18 = vpop.eup %5358  ;;  %v3452_v21 = vld [vmem:[%s6170_s2] sm:$0xf]  ;;  %v3457_v26 = vld [vmem:[%s6170_s2 + $0x14] sm:$0xf] }
 0x336   :  { %v2803_v22 = vmul.f32 %v5359_v18, %v6027_v33  ;;  %4983 = vmatprep.subr.msk.mxu0 %vm3466_vm4, %v3452_v21  ;;  %4988 = vmatprep.subr.msk.mxu1 %vm3466_vm4, %v3453_v24 }
 0x337   :  { %4973 = vmatprep.mubr.msk.f32.mxu0 %vm2627_vm3, %v2800_v63 }
 0x338   :  { %v5361_v19 = vpop.eup %5360  ;;  %4974 = vmatmul.mubr.msk.f32.vlgmr.msra.gmra.mrb[38].mxu0 %vm2627_vm3, %v2801_v17 }
 0x339   :  { %v2802_v20 = vmul.f32 %v5361_v19, %v6031_v34  ;;  %4984 = vmatpush3.msk.msra.mxu0 %vm3466_vm4, %v3452_v21 }
 0x33a   :  { %4993 = vmatprep.subr.msk.mxu0 %vm3466_vm4, %v3454_v25 }
 0x33b   :  { %4980 = vmatprep.mubr.msk.f32.mxu1 %vm2627_vm3, %v2802_v20 }
 0x33c   :  { %4981 = vmatmul.mubr.msk.f32.vlgmr.msra.gmra.mrb[38].mxu1 %vm2627_vm3, %v2803_v22 }
 0x33d   :  { %4989 = vmatpush3.msk.msra.mxu1 %vm3466_vm4, %v3453_v24 }
 0x33e   :  { %4998 = vmatprep.subr.msk.mxu1 %vm3466_vm4, %v3455_v1 }
 0x3f3   :  { %v4933_v3 = vpop.f32.mrb[32].mxu0 }
 0x3f4   :  { %v2876_v11 = vpop.f32.mrb[33].mxu0 }
 0x3f5   :  { %4985 = vmatprep.mubr.msk.f32.mxu0 %vm1930_vm1, %v2876_v11 }
 0x3f6   :  { %4986 = vmatmul.mubr.msk.f32.vlgmr.msra.gmra.mrb[40].mxu0 %vm1930_vm1, %v4933_v3 }
 0x3f7   :  { %v4940_v29 = vpop.f32.mrb[32].mxu1  ;;  %4994 = vmatpush3.msk.msra.mxu0 %vm3466_vm4, %v3454_v25  ;;  %v4374_v25 = vld [vmem:[%s6171_s3] ss:$0 sm:$0xff] }
 0x3f8   :  { %v2957_v31 = vpop.f32.mrb[33].mxu1  ;;  %5003 = vmatprep.subr.msk.mxu0 %vm3466_vm4, %v3456_v27 }
 0x3f9   :  { %4990 = vmatprep.mubr.msk.f32.mxu1 %vm1930_vm1, %v2957_v31 }
 0x3fa   :  { %4991 = vmatmul.mubr.msk.f32.vlgmr.msra.gmra.mrb[40].mxu1 %vm1930_vm1, %v4940_v29 }
 0x3fb   :  { %v4947_v28 = vpop.f32.mrb[34].mxu0  ;;  %4999 = vmatpush3.msk.msra.mxu1 %vm3466_vm4, %v3455_v1 }
 0x3fc   :  { %v3038_v33 = vpop.f32.mrb[35].mxu0  ;;  %5008 = vmatprep.subr.msk.mxu1 %vm3466_vm4, %v3457_v26 }
 0x3fd   :  { %4995 = vmatprep.mubr.msk.f32.mxu0 %vm1930_vm1, %v3038_v33 }
 0x3fe   :  { %4996 = vmatmul.mubr.msk.f32.vlgmr.msra.gmra.mrb[42].mxu0 %vm1930_vm1, %v4947_v28 }
 0x3ff   :  { %v4954_v34 = vpop.f32.mrb[34].mxu1  ;;  %5004 = vmatpush3.msk.msra.mxu0 %vm3466_vm4, %v3456_v27 }
 0x400   :  { %v3119_v30 = vpop.f32.mrb[35].mxu1  ;;  %5013 = vmatprep.subr.msk.mxu0 %vm3466_vm4, %v3458_v23 }
 0x401   :  { %5000 = vmatprep.mubr.msk.f32.mxu1 %vm1930_vm1, %v3119_v30 }
 0x402   :  { %5001 = vmatmul.mubr.msk.f32.vlgmr.msra.gmra.mrb[42].mxu1 %vm1930_vm1, %v4954_v34 }
 0x403   :  { %v4961_v36 = vpop.f32.mrb[36].mxu0  ;;  %5009 = vmatpush3.msk.msra.mxu1 %vm3466_vm4, %v3457_v26 }
 0x404   :  { %v3200_v37 = vpop.f32.mrb[37].mxu0  ;;  %5018 = vmatprep.subr.msk.mxu1 %vm3466_vm4, %v3459_v32 }
 0x405   :  { %5005 = vmatprep.mubr.msk.f32.mxu0 %vm1930_vm1, %v3200_v37 }
 0x406   :  { %5006 = vmatmul.mubr.msk.f32.vlgmr.msra.gmra.mrb[44].mxu0 %vm1930_vm1, %v4961_v36 }
 0x407   :  { %v4968_v40 = vpop.f32.mrb[36].mxu1  ;;  %5014 = vmatpush3.msk.msra.mxu0 %vm3466_vm4, %v3458_v23 }
 0x408   :  { %v3281_v39 = vpop.f32.mrb[37].mxu1 }
 0x409   :  { %5010 = vmatprep.mubr.msk.f32.mxu1 %vm1930_vm1, %v3281_v39 }
 0x40a   :  { %5011 = vmatmul.mubr.msk.f32.vlgmr.msra.gmra.mrb[44].mxu1 %vm1930_vm1, %v4968_v40 }
 0x40b   :  { %v4975_v42 = vpop.f32.mrb[38].mxu0  ;;  %5019 = vmatpush3.msk.msra.mxu1 %vm3466_vm4, %v3459_v32 }
 0x40c   :  { %v3362_v44 = vpop.f32.mrb[39].mxu0 }
 0x40d   :  { %5015 = vmatprep.mubr.msk.f32.mxu0 %vm1930_vm1, %v3362_v44 }
 0x40e   :  { %5016 = vmatmul.mubr.msk.f32.vlgmr.msra.gmra.mrb[46].mxu0 %vm1930_vm1, %v4975_v42 }
 0x40f   :  { %v4982_v45 = vpop.f32.mrb[38].mxu1 }
 0x410   :  { %v3443_v46 = vpop.f32.mrb[39].mxu1 }
 0x411   :  { %5020 = vmatprep.mubr.msk.f32.mxu1 %vm1930_vm1, %v3443_v46 }
 0x412   :  { %5021 = vmatmul.mubr.msk.f32.vlgmr.msra.gmra.mrb[46].mxu1 %vm1930_vm1, %v4982_v45 }
 0x4c9   :  { %v4987_v43 = vpop.f32.mrb[40].mxu0 }
 0x4ca   :  { %v3536_v47 = vpop.f32.mrb[41].mxu0  ;;  %v4148_v52 = vsel %vm55_vm0, %v4987_v43, 0.0 }
 0x4cb   :  { %v4133_v51 = vsel %vm55_vm0, %v3536_v47, 0.0 }
 0x4cd   :  { %v4992_v50 = vpop.f32.mrb[40].mxu1 }
 0x4ce   :  { %v4149_v49 = vsel %vm55_vm0, %v4992_v50, 0.0  ;;  %v3620_v54 = vpop.f32.mrb[41].mxu1 }
 0x4cf   :  { %v4150_v57 = vadd.f32 %v4149_v49, %v4148_v52  ;;  %v4134_v58 = vsel %vm55_vm0, %v3620_v54, 0.0 }
 0x4d0   :  { %v4135_v60 = vadd.f32 %v4134_v58, %v4133_v51 }
 0x4d1   :  { %v4997_v62 = vpop.f32.mrb[42].mxu0 }
 0x4d2   :  { %v4151_v0 = vsel %vm55_vm0, %v4997_v62, 0.0  ;;  %v3704_v35 = vpop.f32.mrb[43].mxu0 }
 0x4d3   :  { %v4152_v41 = vadd.f32 %v4151_v0, %v4150_v57  ;;  %v4136_v48 = vsel %vm55_vm0, %v3704_v35, 0.0 }
 0x4d4   :  { %v4137_v38 = vadd.f32 %v4136_v48, %v4135_v60 }
 0x4d5   :  { %v5002_v53 = vpop.f32.mrb[42].mxu1 }
 0x4d6   :  { %v4153_v6 = vsel %vm55_vm0, %v5002_v53, 0.0  ;;  %v3788_v2 = vpop.f32.mrb[43].mxu1 }
 0x4d7   :  { %v4154_v55 = vadd.f32 %v4153_v6, %v4152_v41  ;;  %v4138_v8 = vsel %vm55_vm0, %v3788_v2, 0.0 }
 0x4d8   :  { %v4139_v59 = vadd.f32 %v4138_v8, %v4137_v38 }
 0x4d9   :  { %v5007_v5 = vpop.f32.mrb[44].mxu0 }
 0x4da   :  { %v4155_v56 = vsel %vm55_vm0, %v5007_v5, 0.0  ;;  %v3872_v7 = vpop.f32.mrb[45].mxu0 }
 0x4db   :  { %v4156_v10 = vadd.f32 %v4155_v56, %v4154_v55  ;;  %v4140_v13 = vsel %vm55_vm0, %v3872_v7, 0.0 }
 0x4dc   :  { %v4141_v9 = vadd.f32 %v4140_v13, %v4139_v59 }
 0x4dd   :  { %v5012_v4 = vpop.f32.mrb[44].mxu1 }
 0x4de   :  { %v4157_v12 = vsel %vm55_vm0, %v5012_v4, 0.0  ;;  %v3956_v14 = vpop.f32.mrb[45].mxu1 }
 0x4df   :  { %v4158_v15 = vadd.f32 %v4157_v12, %v4156_v10  ;;  %v4142_v61 = vsel %vm55_vm0, %v3956_v14, 0.0 }
 0x4e0   :  { %v4143_v16 = vadd.f32 %v4142_v61, %v4141_v9 }
 0x4e1   :  { %v5017_v63 = vpop.f32.mrb[46].mxu0 }
 0x4e2   :  { %v4159_v17 = vsel %vm55_vm0, %v5017_v63, 0.0  ;;  %v4040_v18 = vpop.f32.mrb[47].mxu0 }
 0x4e3   :  { %v4160_v19 = vadd.f32 %v4159_v17, %v4158_v15  ;;  %v4144_v20 = vsel %vm55_vm0, %v4040_v18, 0.0 }
 0x4e4   :  { %v4145_v22 = vadd.f32 %v4144_v20, %v4143_v16 }
 0x4e5   :  { %v5022_v21 = vpop.f32.mrb[46].mxu1 }
 0x4e6   :  { %v4161_v24 = vsel %vm55_vm0, %v5022_v21, 0.0  ;;  %v4124_v1 = vpop.f32.mrb[47].mxu1 }
 0x4e7   :  { %v4162_v3 = vadd.f32 %v4161_v24, %v4160_v19  ;;  %v4146_v11 = vsel %vm55_vm0, %v4124_v1, 0.0 }
 0x4e8   :  { %v4147_v27 = vadd.f32 %v4146_v11, %v4145_v22 }
 0x4e9   :  { %v4171_v29 = vadd.f32 %v4374_v25, %v4162_v3 }
 0x4ea   :  { %v4170_v31 = vadd.f32 %v4374_v25, %v4147_v27 }
 0x4eb   :  { %4173 = vst.msk [vmem:[#allocation2 + $0x8] sm:$0xff] %vm55_vm0, %v4171_v29 }
 0x4ec   :  { %4172 = vst.msk [vmem:[#allocation2] sm:$0xff] %vm55_vm0, %v4170_v31 }
 0x4ed   :  { %5373 = shalt.err (!%p5370_p4)
}
 0x4ee   :  { %s5374_s30 = scalar_lea.hbm %s6173_s5, 256 }
 0x4ef   :  { %p5375_p5 = scmp.ne.s32.totalorder %s6173_s5, %s5374_s30  ;;  %p5378_p6 = scmp.lt.u32.totalorder %s5374_s30, %s6173_s5 }
 0x4f1   :  { %p5380_p7 = pnand %p5378_p6, %p5375_p5 }
 0x4f3   :  { %5383 = shalt.err (!%p5380_p7)
}
 0x4f4   :  { %s5387_s9 = smov 128   ;;  %s5388_s0 = smov 8  }
 0x4f5   :  { %4185 = dma.vmem_to_hbm [thread:$0]  %s4180_s27, 256, %s6173_s5, [#allocation3], %s5387_s9, %s5387_s9, %s5388_s0  }
 0x4f6   :  { %5384 = dma.done.wait [#allocation3], 256  }
 0x4f7   :  { %5385 = vsyncadd [#allocation3], 4294967040 }
 0x4f8   :  { %4189 = vsyncpa [#allocation3], 1 }

</bundles_post_ra>
